<compile_context>
chip_gen: v7x
topology: tpu7x:2x2x1
jax: 0.10.0
libtpu: 0.0.40
codegen_flags: <defaults>
</compile_context>

<pallas_src>
import functools

import jax
import jax.numpy as jnp
from jax.experimental import pallas as pl
from jax.experimental.pallas import tpu as pltpu

RANKS = ["kingdom", "phylum", "class", "order", "family", "genus", "species"]


def _round_up(x, m):
    return ((x + m - 1) // m) * m


def _cdiv(a, b):
    return -(-a // b)


def _encode_classify_kernel(
    pooled_ref,    # (TB, Kp)   bf16 : mean-pooled patch slab for batch tile i
    w_pe_ref,      # (Kp, D)    bf16 : patch-embed weight (resident)
    b_pe_ref,      # (1, D)     f32
    ln_g_ref,      # (1, D)     f32
    ln_b_ref,      # (1, D)     f32
    w_proj_ref,    # (D, OUT)   bf16
    w_heads_ref,   # (OUT, Lp)  bf16 : fused 7-rank heads, lane-padded
    b_heads_ref,   # (1, Lp)    f32
    feat_ref,      # out: (TB, OUT) f32
    logits_ref,    # out: (TB, Lp)  f32
):
    # patch embedding on the pooled patches (exact: linear+bias commutes w/ mean)
    emb = (
        jnp.dot(pooled_ref[...], w_pe_ref[...], preferred_element_type=jnp.float32)
        + b_pe_ref[...]
    )                                                            # (TB, D) f32

    # LayerNorm over the feature axis (f32 on VPU, rsqrt on EUP)
    mu = jnp.mean(emb, axis=-1, keepdims=True)
    var = jnp.mean((emb - mu) ** 2, axis=-1, keepdims=True)
    normed = (emb - mu) * jax.lax.rsqrt(var + 1e-5)
    normed = normed * ln_g_ref[...] + ln_b_ref[...]

    # projection to CLIP output_dim
    feats = jnp.dot(normed.astype(jnp.bfloat16), w_proj_ref[...],
                    preferred_element_type=jnp.float32)          # (TB, OUT) f32
    feat_ref[...] = feats.astype(feat_ref.dtype)

    # fused per-rank classifier heads (7 x Linear(out_dim, 2)), lane-padded
    logits = (
        jnp.dot(feats.astype(jnp.bfloat16), w_heads_ref[...],
                preferred_element_type=jnp.float32)
        + b_heads_ref[...]
    )                                                            # (TB, Lp) f32
    logits_ref[...] = logits.astype(logits_ref.dtype)


def _patchify_nchw(images, patch):
    """NCHW -> (B, P, C*ph*pw), channel-major inside a patch (matches Conv2d)."""
    b, c, h, w = images.shape
    gh, gw = h // patch, w // patch
    x = images.reshape(b, c, gh, patch, gw, patch)
    x = jnp.transpose(x, (0, 2, 4, 1, 3, 5))          # (B, gh, gw, C, ph, pw)
    return x.reshape(b, gh * gw, c * patch * patch)   # (B, P, patch_dim)


def _const_spec(shape, single_buffer):
    """Resident (constant-index) BlockSpec; single-buffered if requested."""
    idx = lambda i: (0,) * len(shape)
    if single_buffer:
        return pl.BlockSpec(shape, idx, pipeline_mode=pl.Buffered(1))
    return pl.BlockSpec(shape, idx)


@functools.partial(jax.jit, static_argnames=("patch", "single_buffer_weights"))
def marine_classifier_forward(images, params, *, patch, single_buffer_weights=True):
    """images: (B, C, H, W) f32. Returns (dict rank -> (B, 2) logits, (B, OUT) feats)."""
    b = images.shape[0]
    patches = _patchify_nchw(images, patch)            # (B, P, K0) f32
    pooled = jnp.mean(patches, axis=1)                 # (B, K0) f32 (exact: encoder is
    k0 = pooled.shape[1]                               #   linear up to the mean-pool)

    d = params["w_pe"].shape[1]
    out_dim = params["w_proj"].shape[1]
    n_logits = params["w_heads"].shape[1]

    # ---- TPU-friendly padding / tiling ----
    kp = _round_up(k0, 128)                 # dense K tiles for the MXU
    lp = _round_up(n_logits, 128)           # lane-dense logits output block

    # >=2 batch tiles so v7x's two TensorCores both get work on the "parallel"
    # axis; 256-row cap fills the 256-wide MXU on v6e/v7x.
    half = max(1, (b + 1) // 2)
    tb = min(256, _round_up(half, 8))
    nb = max(2, _cdiv(b, tb))
    b_pad = nb * tb

    x = jnp.pad(pooled, ((0, b_pad - b), (0, kp - k0))).astype(jnp.bfloat16)

    w_pe = jnp.pad(params["w_pe"], ((0, kp - k0), (0, 0))).astype(jnp.bfloat16)
    w_proj = params["w_proj"].astype(jnp.bfloat16)
    w_heads = jnp.pad(
        params["w_heads"], ((0, 0), (0, lp - n_logits))
    ).astype(jnp.bfloat16)
    b_heads = jnp.pad(params["b_heads"], ((0, 0), (0, lp - n_logits)))

    # ---- advisory cost estimate for XLA scheduling ----
    weight_bytes = (kp * d + d * out_dim + out_dim * lp) * 2 + (3 * d + lp) * 4
    cost = pl.CostEstimate(
        flops=2 * b_pad * (kp * d + d * out_dim + out_dim * lp),
        transcendentals=b_pad,
        bytes_accessed=(b_pad * kp * 2 + weight_bytes + b_pad * (out_dim + lp) * 4),
    )

    # ---- tight VMEM budget: resident weights (x1 if single-buffered) +
    # double-buffered pooled slab + double-buffered outputs, +25% headroom.
    wbuf = 1 if single_buffer_weights else 2
    vmem_bytes = (
        wbuf * weight_bytes
        + 2 * tb * kp * 2                 # pooled slab stream (bf16, double-buffered)
        + 2 * tb * (out_dim + lp) * 4     # f32 outputs (double-buffered)
    )
    vmem_limit = int(min(64 << 20, max(int(vmem_bytes * 1.25) + (1 << 20), 4 << 20)))

    feats, logits = pl.pallas_call(
        _encode_classify_kernel,
        out_shape=(
            jax.ShapeDtypeStruct((b_pad, out_dim), jnp.float32),
            jax.ShapeDtypeStruct((b_pad, lp), jnp.float32),
        ),
        grid_spec=pltpu.PrefetchScalarGridSpec(
            num_scalar_prefetch=0,
            grid=(nb,),
            in_specs=[
                pl.BlockSpec((tb, kp), lambda i: (i, 0)),      # pooled slab stream
                _const_spec((kp, d), single_buffer_weights),   # resident weights
                _const_spec((1, d), single_buffer_weights),
                _const_spec((1, d), single_buffer_weights),
                _const_spec((1, d), single_buffer_weights),
                _const_spec((d, out_dim), single_buffer_weights),
                _const_spec((out_dim, lp), single_buffer_weights),
                _const_spec((1, lp), single_buffer_weights),
            ],
            out_specs=(
                pl.BlockSpec((tb, out_dim), lambda i: (i, 0)),
                pl.BlockSpec((tb, lp), lambda i: (i, 0)),
            ),
        ),
        compiler_params=pltpu.CompilerParams(
            dimension_semantics=("parallel",),
            vmem_limit_bytes=vmem_limit,
        ),
        cost_estimate=cost,
    )(x, w_pe, params["b_pe"], params["ln_g"], params["ln_b"],
      w_proj, w_heads, b_heads)

    feats = feats[:b]
    logits = logits[:b, :n_logits]

    # Split fused head logits into the per-rank dict (empty taxonomy_tree =>
    # every rank gets max(2, 0) = 2 output classes, exactly like the module).
    n_cls = n_logits // len(RANKS)
    outputs = {
        rank: logits[:, i * n_cls:(i + 1) * n_cls] for i, rank in enumerate(RANKS)
    }
    return outputs, feats


def init_params(key, *, patch_dim, width, out_dim, n_ranks, n_cls):
    ks = jax.random.split(key, 4)
    scale_pe = 1.0 / jnp.sqrt(patch_dim)
    scale_pr = 1.0 / jnp.sqrt(width)
    scale_hd = 1.0 / jnp.sqrt(out_dim)
    return {
        "w_pe": (jax.random.normal(ks[0], (patch_dim, width), jnp.float32) * scale_pe),
        "b_pe": jnp.zeros((1, width), jnp.float32),
        "ln_g": jnp.ones((1, width), jnp.float32),
        "ln_b": jnp.zeros((1, width), jnp.float32),
        "w_proj": (jax.random.normal(ks[1], (width, out_dim), jnp.float32) * scale_pr),
        "w_heads": (
            jax.random.normal(ks[2], (out_dim, n_ranks * n_cls), jnp.float32) * scale_hd
        ),
        "b_heads": (
            jax.random.normal(ks[3], (1, n_ranks * n_cls), jnp.float32) * 0.01
        ),
    }


def _reference_forward(images, params, patch):
    """Pure-JAX f32 reference of the same math (pool commuted before embed)."""
    patches = _patchify_nchw(images, patch)
    pooled = jnp.mean(patches, axis=1)
    emb = pooled @ params["w_pe"] + params["b_pe"]
    mu = jnp.mean(emb, axis=-1, keepdims=True)
    var = jnp.mean((emb - mu) ** 2, axis=-1, keepdims=True)
    normed = (emb - mu) * jax.lax.rsqrt(var + 1e-5)
    normed = normed * params["ln_g"] + params["ln_b"]
    feats = normed @ params["w_proj"]
    logits = feats @ params["w_heads"] + params["b_heads"]
    return feats, logits


if __name__ == "__main__":
    # Small shapes: batch=2, 3-channel 16x16 images, patch=8 -> 4 patches,
    # encoder width=128, CLIP output_dim=128, 7 ranks x 2 classes each.
    B, C, H, W = 2, 3, 16, 16
    PATCH = 8
    WIDTH = 128
    OUT_DIM = 128
    N_CLS = 2

    key = jax.random.PRNGKey(0)
    k_img, k_par = jax.random.split(key)
    images = jax.random.normal(k_img, (B, C, H, W), jnp.float32)

    params = init_params(
        k_par,
        patch_dim=C * PATCH * PATCH,
        width=WIDTH,
        out_dim=OUT_DIM,
        n_ranks=len(RANKS),
        n_cls=N_CLS,
    )

    def _run(single_buffer):
        out = marine_classifier_forward(
            images, params, patch=PATCH, single_buffer_weights=single_buffer)
        jax.block_until_ready(out)
        return out

    try:
        outputs, feats = _run(True)
    except Exception:
        # This JAX build rejects pipeline_mode=pl.Buffered(1); fall back to the
        # default double-buffered resident weights (functionally identical).
        outputs, feats = _run(False)

    # Shape sanity: each rank has (B, 2) logits, features are (B, OUT_DIM).
    assert feats.shape == (B, OUT_DIM)
    for rank in RANKS:
        assert outputs[rank].shape == (B, N_CLS)

    # Numerical sanity vs f32 reference (bf16 MXU operands -> relative check).
    ref_feats, ref_logits = _reference_forward(images, params, PATCH)
    logits_cat = jnp.concatenate([outputs[r] for r in RANKS], axis=-1)

    def _check(got, ref):
        err = float(jnp.max(jnp.abs(got - ref)))
        tol = 0.05 + 0.02 * float(jnp.max(jnp.abs(ref)))
        assert err < tol, (err, tol)

    _check(feats, ref_feats)
    _check(logits_cat, ref_logits)

    print("KERNEL_OK")
</pallas_src>

<mosaic_0001>
module attributes {stable_mosaic.version = 11 : i64} {
  func.func @_encode_classify_kernel(%arg0: i32, %arg1: memref<8x256xbf16, #tpu.memory_space<vmem>>, %arg2: memref<256x128xbf16, #tpu.memory_space<vmem>>, %arg3: memref<1x128xf32, #tpu.memory_space<vmem>>, %arg4: memref<1x128xf32, #tpu.memory_space<vmem>>, %arg5: memref<1x128xf32, #tpu.memory_space<vmem>>, %arg6: memref<128x128xbf16, #tpu.memory_space<vmem>>, %arg7: memref<128x128xbf16, #tpu.memory_space<vmem>>, %arg8: memref<1x128xf32, #tpu.memory_space<vmem>>, %arg9: memref<8x128xf32, #tpu.memory_space<vmem>>, %arg10: memref<8x128xf32, #tpu.memory_space<vmem>>) attributes {dimension_semantics = [#tpu.dimension_semantics<parallel>], iteration_bounds = array<i64: 2>, scalar_prefetch = 0 : i64, scratch_operands = 0 : i64, tpu.core_type = #tpu.core_type<tc>, window_params = [{transform_indices = @transform_0, window_bounds = array<i64: 8, 256>}, {pipeline_mode = #tpu.pipeline_mode<synchronous>, transform_indices = @transform_1, window_bounds = array<i64: 256, 128>}, {pipeline_mode = #tpu.pipeline_mode<synchronous>, transform_indices = @transform_2, window_bounds = array<i64: 1, 128>}, {pipeline_mode = #tpu.pipeline_mode<synchronous>, transform_indices = @transform_3, window_bounds = array<i64: 1, 128>}, {pipeline_mode = #tpu.pipeline_mode<synchronous>, transform_indices = @transform_4, window_bounds = array<i64: 1, 128>}, {pipeline_mode = #tpu.pipeline_mode<synchronous>, transform_indices = @transform_5, window_bounds = array<i64: 128, 128>}, {pipeline_mode = #tpu.pipeline_mode<synchronous>, transform_indices = @transform_6, window_bounds = array<i64: 128, 128>}, {pipeline_mode = #tpu.pipeline_mode<synchronous>, transform_indices = @transform_7, window_bounds = array<i64: 1, 128>}, {transform_indices = @transform_8, window_bounds = array<i64: 8, 128>}, {transform_indices = @transform_9, window_bounds = array<i64: 8, 128>}]} {
    %c0 = arith.constant 0 : index
    %c0_0 = arith.constant 0 : index
    %0 = vector.load %arg1[%c0, %c0_0] : memref<8x256xbf16, #tpu.memory_space<vmem>>, vector<8x256xbf16>
    %c0_1 = arith.constant 0 : index
    %c0_2 = arith.constant 0 : index
    %1 = vector.load %arg2[%c0_1, %c0_2] : memref<256x128xbf16, #tpu.memory_space<vmem>>, vector<256x128xbf16>
    %cst = arith.constant dense<0.000000e+00> : vector<8x128xf32>
    %2 = tpu.matmul %0, %1, %cst {dimension_numbers = #tpu.dot_dimension_numbers<[1], [0], [0], [1], [0, 0, 1, 1], [], []>} : vector<8x256xbf16>, vector<256x128xbf16>, vector<8x128xf32> -> vector<8x128xf32>
    %c0_3 = arith.constant 0 : index
    %c0_4 = arith.constant 0 : index
    %3 = vector.load %arg3[%c0_3, %c0_4] : memref<1x128xf32, #tpu.memory_space<vmem>>, vector<1x128xf32>
    %4 = vector.broadcast %3 : vector<1x128xf32> to vector<8x128xf32>
    %5 = arith.addf %2, %4 : vector<8x128xf32>
    %cst_5 = arith.constant dense<0.000000e+00> : vector<8xf32>
    %6 = vector.multi_reduction <add>, %5, %cst_5 [1] : vector<8x128xf32> to vector<8xf32>
    %7 = vector.shape_cast %6 : vector<8xf32> to vector<8x1xf32>
    %cst_6 = arith.constant 1.280000e+02 : f32
    %8 = vector.broadcast %cst_6 : f32 to vector<8x1xf32>
    %9 = arith.divf %7, %8 : vector<8x1xf32>
    %10 = vector.broadcast %9 : vector<8x1xf32> to vector<8x128xf32>
    %11 = arith.subf %5, %10 : vector<8x128xf32>
    %12 = arith.mulf %11, %11 : vector<8x128xf32>
    %cst_7 = arith.constant dense<0.000000e+00> : vector<8xf32>
    %13 = vector.multi_reduction <add>, %12, %cst_7 [1] : vector<8x128xf32> to vector<8xf32>
    %14 = vector.shape_cast %13 : vector<8xf32> to vector<8x1xf32>
    %cst_8 = arith.constant 1.280000e+02 : f32
    %15 = vector.broadcast %cst_8 : f32 to vector<8x1xf32>
    %16 = arith.divf %14, %15 : vector<8x1xf32>
    %17 = vector.broadcast %9 : vector<8x1xf32> to vector<8x128xf32>
    %18 = arith.subf %5, %17 : vector<8x128xf32>
    %cst_9 = arith.constant 9.99999974E-6 : f32
    %19 = vector.broadcast %cst_9 : f32 to vector<8x1xf32>
    %20 = arith.addf %16, %19 : vector<8x1xf32>
    %21 = math.rsqrt %20 : vector<8x1xf32>
    %22 = vector.broadcast %21 : vector<8x1xf32> to vector<8x128xf32>
    %23 = arith.mulf %18, %22 : vector<8x128xf32>
    %c0_10 = arith.constant 0 : index
    %c0_11 = arith.constant 0 : index
    %24 = vector.load %arg4[%c0_10, %c0_11] : memref<1x128xf32, #tpu.memory_space<vmem>>, vector<1x128xf32>
    %25 = vector.broadcast %24 : vector<1x128xf32> to vector<8x128xf32>
    %26 = arith.mulf %23, %25 : vector<8x128xf32>
    %c0_12 = arith.constant 0 : index
    %c0_13 = arith.constant 0 : index
    %27 = vector.load %arg5[%c0_12, %c0_13] : memref<1x128xf32, #tpu.memory_space<vmem>>, vector<1x128xf32>
    %28 = vector.broadcast %27 : vector<1x128xf32> to vector<8x128xf32>
    %29 = arith.addf %26, %28 : vector<8x128xf32>
    %30 = arith.truncf %29 : vector<8x128xf32> to vector<8x128xbf16>
    %c0_14 = arith.constant 0 : index
    %c0_15 = arith.constant 0 : index
    %31 = vector.load %arg6[%c0_14, %c0_15] : memref<128x128xbf16, #tpu.memory_space<vmem>>, vector<128x128xbf16>
    %cst_16 = arith.constant dense<0.000000e+00> : vector<8x128xf32>
    %32 = tpu.matmul %30, %31, %cst_16 {dimension_numbers = #tpu.dot_dimension_numbers<[1], [0], [0], [1], [0, 0, 1, 1], [], []>} : vector<8x128xbf16>, vector<128x128xbf16>, vector<8x128xf32> -> vector<8x128xf32>
    %c0_17 = arith.constant 0 : index
    %c0_18 = arith.constant 0 : index
    %33 = vector.load %arg9[%c0_17, %c0_18] : memref<8x128xf32, #tpu.memory_space<vmem>>, vector<8x128xf32>
    tpu.vector_store %arg9[%c0_17, %c0_18], %32 {strides = array<i32>} : memref<8x128xf32, #tpu.memory_space<vmem>>, vector<8x128xf32>,
    %34 = arith.truncf %32 : vector<8x128xf32> to vector<8x128xbf16>
    %c0_19 = arith.constant 0 : index
    %c0_20 = arith.constant 0 : index
    %35 = vector.load %arg7[%c0_19, %c0_20] : memref<128x128xbf16, #tpu.memory_space<vmem>>, vector<128x128xbf16>
    %cst_21 = arith.constant dense<0.000000e+00> : vector<8x128xf32>
    %36 = tpu.matmul %34, %35, %cst_21 {dimension_numbers = #tpu.dot_dimension_numbers<[1], [0], [0], [1], [0, 0, 1, 1], [], []>} : vector<8x128xbf16>, vector<128x128xbf16>, vector<8x128xf32> -> vector<8x128xf32>
    %c0_22 = arith.constant 0 : index
    %c0_23 = arith.constant 0 : index
    %37 = vector.load %arg8[%c0_22, %c0_23] : memref<1x128xf32, #tpu.memory_space<vmem>>, vector<1x128xf32>
    %38 = vector.broadcast %37 : vector<1x128xf32> to vector<8x128xf32>
    %39 = arith.addf %36, %38 : vector<8x128xf32>
    %c0_24 = arith.constant 0 : index
    %c0_25 = arith.constant 0 : index
    %40 = vector.load %arg10[%c0_24, %c0_25] : memref<8x128xf32, #tpu.memory_space<vmem>>, vector<8x128xf32>
    tpu.vector_store %arg10[%c0_24, %c0_25], %39 {strides = array<i32>} : memref<8x128xf32, #tpu.memory_space<vmem>>, vector<8x128xf32>,
    return
  }
  func.func @transform_0(%arg0: i32) -> (i32, i32) {
    %c0_i32 = arith.constant 0 : i32
    %c0_i32_0 = arith.constant 0 : i32
    return %arg0, %c0_i32 : i32, i32
  }
  func.func @transform_1(%arg0: i32) -> (i32, i32) {
    %c0_i32 = arith.constant 0 : i32
    %c0_i32_0 = arith.constant 0 : i32
    %c0_i32_1 = arith.constant 0 : i32
    return %c0_i32, %c0_i32_0 : i32, i32
  }
  func.func @transform_2(%arg0: i32) -> (i32, i32) {
    %c0_i32 = arith.constant 0 : i32
    %c0_i32_0 = arith.constant 0 : i32
    %c0_i32_1 = arith.constant 0 : i32
    return %c0_i32, %c0_i32_0 : i32, i32
  }
  func.func @transform_3(%arg0: i32) -> (i32, i32) {
    %c0_i32 = arith.constant 0 : i32
    %c0_i32_0 = arith.constant 0 : i32
    %c0_i32_1 = arith.constant 0 : i32
    return %c0_i32, %c0_i32_0 : i32, i32
  }
  func.func @transform_4(%arg0: i32) -> (i32, i32) {
    %c0_i32 = arith.constant 0 : i32
    %c0_i32_0 = arith.constant 0 : i32
    %c0_i32_1 = arith.constant 0 : i32
    return %c0_i32, %c0_i32_0 : i32, i32
  }
  func.func @transform_5(%arg0: i32) -> (i32, i32) {
    %c0_i32 = arith.constant 0 : i32
    %c0_i32_0 = arith.constant 0 : i32
    %c0_i32_1 = arith.constant 0 : i32
    return %c0_i32, %c0_i32_0 : i32, i32
  }
  func.func @transform_6(%arg0: i32) -> (i32, i32) {
    %c0_i32 = arith.constant 0 : i32
    %c0_i32_0 = arith.constant 0 : i32
    %c0_i32_1 = arith.constant 0 : i32
    return %c0_i32, %c0_i32_0 : i32, i32
  }
  func.func @transform_7(%arg0: i32) -> (i32, i32) {
    %c0_i32 = arith.constant 0 : i32
    %c0_i32_0 = arith.constant 0 : i32
    %c0_i32_1 = arith.constant 0 : i32
    return %c0_i32, %c0_i32_0 : i32, i32
  }
  func.func @transform_8(%arg0: i32) -> (i32, i32) {
    %c0_i32 = arith.constant 0 : i32
    %c0_i32_0 = arith.constant 0 : i32
    return %arg0, %c0_i32 : i32, i32
  }
  func.func @transform_9(%arg0: i32) -> (i32, i32) {
    %c0_i32 = arith.constant 0 : i32
    %c0_i32_0 = arith.constant 0 : i32
    return %arg0, %c0_i32 : i32, i32
  }
}

module attributes {stable_mosaic.version = 11 : i64} {
  func.func @_encode_classify_kernel(%arg0: i32, %arg1: memref<8x256xbf16, #tpu.memory_space<vmem>>, %arg2: memref<256x128xbf16, #tpu.memory_space<vmem>>, %arg3: memref<1x128xf32, #tpu.memory_space<vmem>>, %arg4: memref<1x128xf32, #tpu.memory_space<vmem>>, %arg5: memref<1x128xf32, #tpu.memory_space<vmem>>, %arg6: memref<128x128xbf16, #tpu.memory_space<vmem>>, %arg7: memref<128x128xbf16, #tpu.memory_space<vmem>>, %arg8: memref<1x128xf32, #tpu.memory_space<vmem>>, %arg9: memref<8x128xf32, #tpu.memory_space<vmem>>, %arg10: memref<8x128xf32, #tpu.memory_space<vmem>>) attributes {dimension_semantics = [#tpu.dimension_semantics<parallel>], iteration_bounds = array<i64: 2>, scalar_prefetch = 0 : i64, scratch_operands = 0 : i64, tpu.core_type = #tpu.core_type<tc>, window_params = [{transform_indices = @transform_0, window_bounds = array<i64: 8, 256>}, {pipeline_mode = #tpu.pipeline_mode<synchronous>, transform_indices = @transform_1, window_bounds = array<i64: 256, 128>}, {pipeline_mode = #tpu.pipeline_mode<synchronous>, transform_indices = @transform_2, window_bounds = array<i64: 1, 128>}, {pipeline_mode = #tpu.pipeline_mode<synchronous>, transform_indices = @transform_3, window_bounds = array<i64: 1, 128>}, {pipeline_mode = #tpu.pipeline_mode<synchronous>, transform_indices = @transform_4, window_bounds = array<i64: 1, 128>}, {pipeline_mode = #tpu.pipeline_mode<synchronous>, transform_indices = @transform_5, window_bounds = array<i64: 128, 128>}, {pipeline_mode = #tpu.pipeline_mode<synchronous>, transform_indices = @transform_6, window_bounds = array<i64: 128, 128>}, {pipeline_mode = #tpu.pipeline_mode<synchronous>, transform_indices = @transform_7, window_bounds = array<i64: 1, 128>}, {transform_indices = @transform_8, window_bounds = array<i64: 8, 128>}, {transform_indices = @transform_9, window_bounds = array<i64: 8, 128>}]} {
    %c0 = arith.constant 0 : index
    %c0_0 = arith.constant 0 : index
    %0 = vector.load %arg1[%c0, %c0_0] : memref<8x256xbf16, #tpu.memory_space<vmem>>, vector<8x256xbf16>
    %c0_1 = arith.constant 0 : index
    %c0_2 = arith.constant 0 : index
    %1 = vector.load %arg2[%c0_1, %c0_2] : memref<256x128xbf16, #tpu.memory_space<vmem>>, vector<256x128xbf16>
    %cst = arith.constant dense<0.000000e+00> : vector<8x128xf32>
    %2 = tpu.matmul %0, %1, %cst {dimension_numbers = #tpu.dot_dimension_numbers<[1], [0], [0], [1], [0, 0, 1, 1], [], []>} : vector<8x256xbf16>, vector<256x128xbf16>, vector<8x128xf32> -> vector<8x128xf32>
    %c0_3 = arith.constant 0 : index
    %c0_4 = arith.constant 0 : index
    %3 = vector.load %arg3[%c0_3, %c0_4] : memref<1x128xf32, #tpu.memory_space<vmem>>, vector<1x128xf32>
    %4 = vector.broadcast %3 : vector<1x128xf32> to vector<8x128xf32>
    %5 = arith.addf %2, %4 : vector<8x128xf32>
    %cst_5 = arith.constant dense<0.000000e+00> : vector<8xf32>
    %6 = vector.multi_reduction <add>, %5, %cst_5 [1] : vector<8x128xf32> to vector<8xf32>
    %7 = vector.shape_cast %6 : vector<8xf32> to vector<8x1xf32>
    %cst_6 = arith.constant 1.280000e+02 : f32
    %8 = vector.broadcast %cst_6 : f32 to vector<8x1xf32>
    %9 = arith.divf %7, %8 : vector<8x1xf32>
    %10 = vector.broadcast %9 : vector<8x1xf32> to vector<8x128xf32>
    %11 = arith.subf %5, %10 : vector<8x128xf32>
    %12 = arith.mulf %11, %11 : vector<8x128xf32>
    %cst_7 = arith.constant dense<0.000000e+00> : vector<8xf32>
    %13 = vector.multi_reduction <add>, %12, %cst_7 [1] : vector<8x128xf32> to vector<8xf32>
    %14 = vector.shape_cast %13 : vector<8xf32> to vector<8x1xf32>
    %cst_8 = arith.constant 1.280000e+02 : f32
    %15 = vector.broadcast %cst_8 : f32 to vector<8x1xf32>
    %16 = arith.divf %14, %15 : vector<8x1xf32>
    %17 = vector.broadcast %9 : vector<8x1xf32> to vector<8x128xf32>
    %18 = arith.subf %5, %17 : vector<8x128xf32>
    %cst_9 = arith.constant 9.99999974E-6 : f32
    %19 = vector.broadcast %cst_9 : f32 to vector<8x1xf32>
    %20 = arith.addf %16, %19 : vector<8x1xf32>
    %21 = math.rsqrt %20 : vector<8x1xf32>
    %22 = vector.broadcast %21 : vector<8x1xf32> to vector<8x128xf32>
    %23 = arith.mulf %18, %22 : vector<8x128xf32>
    %c0_10 = arith.constant 0 : index
    %c0_11 = arith.constant 0 : index
    %24 = vector.load %arg4[%c0_10, %c0_11] : memref<1x128xf32, #tpu.memory_space<vmem>>, vector<1x128xf32>
    %25 = vector.broadcast %24 : vector<1x128xf32> to vector<8x128xf32>
    %26 = arith.mulf %23, %25 : vector<8x128xf32>
    %c0_12 = arith.constant 0 : index
    %c0_13 = arith.constant 0 : index
    %27 = vector.load %arg5[%c0_12, %c0_13] : memref<1x128xf32, #tpu.memory_space<vmem>>, vector<1x128xf32>
    %28 = vector.broadcast %27 : vector<1x128xf32> to vector<8x128xf32>
    %29 = arith.addf %26, %28 : vector<8x128xf32>
    %30 = arith.truncf %29 : vector<8x128xf32> to vector<8x128xbf16>
    %c0_14 = arith.constant 0 : index
    %c0_15 = arith.constant 0 : index
    %31 = vector.load %arg6[%c0_14, %c0_15] : memref<128x128xbf16, #tpu.memory_space<vmem>>, vector<128x128xbf16>
    %cst_16 = arith.constant dense<0.000000e+00> : vector<8x128xf32>
    %32 = tpu.matmul %30, %31, %cst_16 {dimension_numbers = #tpu.dot_dimension_numbers<[1], [0], [0], [1], [0, 0, 1, 1], [], []>} : vector<8x128xbf16>, vector<128x128xbf16>, vector<8x128xf32> -> vector<8x128xf32>
    %c0_17 = arith.constant 0 : index
    %c0_18 = arith.constant 0 : index
    %33 = vector.load %arg9[%c0_17, %c0_18] : memref<8x128xf32, #tpu.memory_space<vmem>>, vector<8x128xf32>
    tpu.vector_store %arg9[%c0_17, %c0_18], %32 {strides = array<i32>} : memref<8x128xf32, #tpu.memory_space<vmem>>, vector<8x128xf32>,
    %34 = arith.truncf %32 : vector<8x128xf32> to vector<8x128xbf16>
    %c0_19 = arith.constant 0 : index
    %c0_20 = arith.constant 0 : index
    %35 = vector.load %arg7[%c0_19, %c0_20] : memref<128x128xbf16, #tpu.memory_space<vmem>>, vector<128x128xbf16>
    %cst_21 = arith.constant dense<0.000000e+00> : vector<8x128xf32>
    %36 = tpu.matmul %34, %35, %cst_21 {dimension_numbers = #tpu.dot_dimension_numbers<[1], [0], [0], [1], [0, 0, 1, 1], [], []>} : vector<8x128xbf16>, vector<128x128xbf16>, vector<8x128xf32> -> vector<8x128xf32>
    %c0_22 = arith.constant 0 : index
    %c0_23 = arith.constant 0 : index
    %37 = vector.load %arg8[%c0_22, %c0_23] : memref<1x128xf32, #tpu.memory_space<vmem>>, vector<1x128xf32>
    %38 = vector.broadcast %37 : vector<1x128xf32> to vector<8x128xf32>
    %39 = arith.addf %36, %38 : vector<8x128xf32>
    %c0_24 = arith.constant 0 : index
    %c0_25 = arith.constant 0 : index
    %40 = vector.load %arg10[%c0_24, %c0_25] : memref<8x128xf32, #tpu.memory_space<vmem>>, vector<8x128xf32>
    tpu.vector_store %arg10[%c0_24, %c0_25], %39 {strides = array<i32>} : memref<8x128xf32, #tpu.memory_space<vmem>>, vector<8x128xf32>,
    return
  }
  func.func @transform_0(%arg0: i32) -> (i32, i32) {
    %c0_i32 = arith.constant 0 : i32
    %c0_i32_0 = arith.constant 0 : i32
    return %arg0, %c0_i32 : i32, i32
  }
  func.func @transform_1(%arg0: i32) -> (i32, i32) {
    %c0_i32 = arith.constant 0 : i32
    %c0_i32_0 = arith.constant 0 : i32
    %c0_i32_1 = arith.constant 0 : i32
    return %c0_i32, %c0_i32_0 : i32, i32
  }
  func.func @transform_2(%arg0: i32) -> (i32, i32) {
    %c0_i32 = arith.constant 0 : i32
    %c0_i32_0 = arith.constant 0 : i32
    %c0_i32_1 = arith.constant 0 : i32
    return %c0_i32, %c0_i32_0 : i32, i32
  }
  func.func @transform_3(%arg0: i32) -> (i32, i32) {
    %c0_i32 = arith.constant 0 : i32
    %c0_i32_0 = arith.constant 0 : i32
    %c0_i32_1 = arith.constant 0 : i32
    return %c0_i32, %c0_i32_0 : i32, i32
  }
  func.func @transform_4(%arg0: i32) -> (i32, i32) {
    %c0_i32 = arith.constant 0 : i32
    %c0_i32_0 = arith.constant 0 : i32
    %c0_i32_1 = arith.constant 0 : i32
    return %c0_i32, %c0_i32_0 : i32, i32
  }
  func.func @transform_5(%arg0: i32) -> (i32, i32) {
    %c0_i32 = arith.constant 0 : i32
    %c0_i32_0 = arith.constant 0 : i32
    %c0_i32_1 = arith.constant 0 : i32
    return %c0_i32, %c0_i32_0 : i32, i32
  }
  func.func @transform_6(%arg0: i32) -> (i32, i32) {
    %c0_i32 = arith.constant 0 : i32
    %c0_i32_0 = arith.constant 0 : i32
    %c0_i32_1 = arith.constant 0 : i32
    return %c0_i32, %c0_i32_0 : i32, i32
  }
  func.func @transform_7(%arg0: i32) -> (i32, i32) {
    %c0_i32 = arith.constant 0 : i32
    %c0_i32_0 = arith.constant 0 : i32
    %c0_i32_1 = arith.constant 0 : i32
    return %c0_i32, %c0_i32_0 : i32, i32
  }
  func.func @transform_8(%arg0: i32) -> (i32, i32) {
    %c0_i32 = arith.constant 0 : i32
    %c0_i32_0 = arith.constant 0 : i32
    return %arg0, %c0_i32 : i32, i32
  }
  func.func @transform_9(%arg0: i32) -> (i32, i32) {
    %c0_i32 = arith.constant 0 : i32
    %c0_i32_0 = arith.constant 0 : i32
    return %arg0, %c0_i32 : i32, i32
  }
}

</mosaic_0001>

<bundles_post_ra>
// kernel: marine_classifier_forward.1
= control target key start
LH: loop header
LB: loop body
LE: loop exit
PB: predicated region body
PF: predicated region fallthrough
CT: control target
= control target key end

     0   :  { %s1093_s30 = smov 0   ;;  %s1226_s0 = inlined_call_operand.vmem [shape: bf16[16,256], index: 0, kind: input, shape index: {}]   ;;  %s1227_s1 = inlined_call_operand.vmem [shape: bf16[256,128], index: 1, kind: input, shape index: {}]   ;;  %s1228_s2 = inlined_call_operand.vmem [shape: f32[1,128], index: 2, kind: input, shape index: {}]   ;;  %s1229_s3 = inlined_call_operand.vmem [shape: f32[1,128], index: 3, kind: input, shape index: {}]   ;;  %s1230_s4 = inlined_call_operand.vmem [shape: f32[1,128], index: 4, kind: input, shape index: {}]   ;;  %s1231_s5 = inlined_call_operand.vmem [shape: bf16[128,128], index: 5, kind: input, shape index: {}]   ;;  %s1232_s6 = inlined_call_operand.vmem [shape: bf16[128,128], index: 6, kind: input, shape index: {}]   ;;  %s1233_s7 = inlined_call_operand.vmem [shape: f32[1,128], index: 7, kind: input, shape index: {}]   ;;  %s1234_s8 = inlined_call_operand.vmem [shape: f32[16,128], index: 8, kind: output, shape index: {0}]   ;;  %s1235_s9 = inlined_call_operand.vmem [shape: f32[16,128], index: 9, kind: output, shape index: {1}]  }
   0x1 LB: > { %s857_s10 = sadd.s32 4294967295, %s1039_s30   ;;  %p861_p0 = scmp.ge.s32.totalorder %s1039_s30, 1  ;;  %s1039_s30 = sphi %s1093_s30, %s20_s30  }
   0x2   : > { %p290_p1 = scmp.lt.s32.totalorder %s1039_s30, 3 }
   0x4   : > { %p291_p2 = pnand %p861_p0, %p290_p1 }
   0x5   : > { %v997_v0 = vld [vmem:[%s1227_s1 + $0x40] sm:$0xff] (!%p291_p2)   ;;  %v999_v2 = vld [vmem:[%s1227_s1 + $0x48] sm:$0xff] (!%p291_p2)   ;;  %p329_p3 = scmp.lt.s32.totalorder (!%p291_p2), %s857_s10, 1  ;;  %v1001_v4 = vld [vmem:[%s1227_s1 + $0x50] sm:$0xff] (!%p291_p2)   ;;  %v1041_v27 = vmov (!%p291_p2), 0.0   ;;  %vm1042_vm0 = vmmov (!%p291_p2), 0  }
   0x6   : > { %294 = sbr.rel (%p291_p2) target bundleno = 997 (0x3e5), region = 52  ;;  %v998_v1 = vld [vmem:[%s1227_s1] sm:$0xff] (!%p291_p2)   ;;  %907 = vmatprep.subr.bf16.mxu0 (!%p291_p2), %v997_v0  ;;  %v1000_v3 = vld [vmem:[%s1227_s1 + $0x8] sm:$0xff] (!%p291_p2)   ;;  %v1002_v5 = vld [vmem:[%s1227_s1 + $0x10] sm:$0xff] (!%p291_p2)   ;;  %947 = vmatprep.subr.bf16.mxu1 (!%p291_p2), %v1041_v27 }
   0x7   : > { %908 = vmatpush3.bf16.msra.mxu0 (!%p291_p2), %v998_v1  ;;  %v1003_v6 = vld [vmem:[%s1227_s1 + $0x58] sm:$0xff] (!%p291_p2)   ;;  %v1005_v8 = vld [vmem:[%s1227_s1 + $0x60] sm:$0xff] (!%p291_p2)   ;;  %v1007_v10 = vld [vmem:[%s1227_s1 + $0x68] sm:$0xff] (!%p291_p2)   ;;  %963 = vmatprep.mubr.msk.bf16.mxu1 (!%p291_p2), %vm1042_vm0, %v1041_v27 }
   0x8   : > { %909 = vmatprep.subr.bf16.mxu0 (!%p291_p2), %v999_v2  ;;  %v1004_v7 = vld [vmem:[%s1227_s1 + $0x18] sm:$0xff] (!%p291_p2)   ;;  %v1006_v9 = vld [vmem:[%s1227_s1 + $0x20] sm:$0xff] (!%p291_p2)   ;;  %v1008_v12 = vld [vmem:[%s1227_s1 + $0x28] sm:$0xff] (!%p291_p2)  }
   0x9   : > { %v1009_v14 = vld [vmem:[%s1227_s1 + $0x70] sm:$0xff] (!%p291_p2)   ;;  %v1011_v16 = vld [vmem:[%s1227_s1 + $0x78] sm:$0xff] (!%p291_p2)   ;;  %v866_v21 = vld [vmem:[%s1228_s2] ss:$0 sm:$0xff] (!%p291_p2) }
   0xa   : > { %v1010_v15 = vld [vmem:[%s1227_s1 + $0x30] sm:$0xff] (!%p291_p2)   ;;  %v1012_v17 = vld [vmem:[%s1227_s1 + $0x38] sm:$0xff] (!%p291_p2)   ;;  %v1015_v26 = vld [vmem:[%s1231_s5] sm:$0xff] (!%p291_p2)  }
   0xb   : > { %910 = vmatpush3.bf16.msra.mxu0 (!%p291_p2), %v1000_v3  ;;  %948 = vmatpush3.bf16.msra.mxu1 (!%p291_p2), %v1015_v26  ;;  %v1016_v28 = vld [vmem:[%s1231_s5 + $0x8] sm:$0xff] (!%p291_p2)   ;;  %v1017_v33 = vld [vmem:[%s1231_s5 + $0x10] sm:$0xff] (!%p291_p2)   ;;  %v1018_v34 = vld [vmem:[%s1231_s5 + $0x18] sm:$0xff] (!%p291_p2)  }
   0xc   : > { %911 = vmatprep.subr.bf16.mxu0 (!%p291_p2), %v1001_v4  ;;  %949 = vmatprep.subr.bf16.mxu1 (!%p291_p2), %v1041_v27  ;;  %v1019_v35 = vld [vmem:[%s1231_s5 + $0x20] sm:$0xff] (!%p291_p2)   ;;  %v1020_v36 = vld [vmem:[%s1231_s5 + $0x28] sm:$0xff] (!%p291_p2)   ;;  %v1021_v37 = vld [vmem:[%s1231_s5 + $0x30] sm:$0xff] (!%p291_p2)  }
   0xd   : > { %s1237_s10 = smov (!%p329_p3, %s857_s10), 1  ;;  %v1022_v38 = vld [vmem:[%s1231_s5 + $0x38] sm:$0xff]   ;;  %v1023_v39 = vld [vmem:[%s1232_s6] sm:$0xff]   ;;  %v1024_v40 = vld [vmem:[%s1232_s6 + $0x8] sm:$0xff]  }
   0xe   : > { %s1122_s25 = sshll.u32 %s1237_s10, 3  ;;  %v1025_v41 = vld [vmem:[%s1232_s6 + $0x10] sm:$0xff]   ;;  %v1026_v42 = vld [vmem:[%s1232_s6 + $0x18] sm:$0xff]   ;;  %v1027_v43 = vld [vmem:[%s1232_s6 + $0x20] sm:$0xff]  }
   0xf   : > { %912 = vmatpush3.bf16.msra.mxu0 %v1002_v5  ;;  %s333_s13 = scalar_lea.vmem %s1226_s0, %s1122_s25  ;;  %950 = vmatpush3.bf16.msra.mxu1 %v1016_v28  ;;  %v1028_v44 = vld [vmem:[%s1232_s6 + $0x28] sm:$0xff]   ;;  %v1029_v45 = vld [vmem:[%s1232_s6 + $0x30] sm:$0xff]   ;;  %v885_v50 = vld [vmem:[%s1229_s3] ss:$0 sm:$0xff]  ;;  %s337_s11 = scalar_lea.vmem %s1234_s8, %s1122_s25 }
  0x10   : > { %913 = vmatprep.subr.bf16.mxu0 %v1003_v6  ;;  %v343_v11 = vld [vmem:[%s333_s13] sm:$0xff]  ;;  %951 = vmatprep.subr.bf16.mxu1 %v1041_v27  ;;  %v1030_v56 = vld [vmem:[%s1232_s6 + $0x38] sm:$0xff]   ;;  %s341_s10 = scalar_lea.vmem %s1235_s9, %s1122_s25 }
  0x11   : > { %v868_v13 = vcombine.high %v343_v11, %v343_v11  ;;  %v867_v18 = vcombine.low %v343_v11, %v343_v11  ;;  %v886_v52 = vld [vmem:[%s1230_s4] ss:$0 sm:$0xff] }
  0x12   : > { %v895_v62 = vld [vmem:[%s1233_s7] ss:$0 sm:$0xff] }
  0x13   : > { %914 = vmatpush3.bf16.msra.mxu0 %v1004_v7  ;;  %518 = vmatprep.mubr.bf16.mxu0 %v868_v13 }
  0x14   : > { %915 = vmatprep.subr.bf16.mxu0 %v1005_v8  ;;  %952 = vmatpush3.bf16.msra.mxu1 %v1017_v33 }
  0x15   : > { %953 = vmatprep.subr.bf16.mxu1 %v1041_v27 }
  0x17   : > { %916 = vmatpush3.bf16.msra.mxu0 %v1006_v9 }
  0x18   : > { %917 = vmatprep.subr.bf16.mxu0 %v1007_v10  ;;  %954 = vmatpush3.bf16.msra.mxu1 %v1018_v34 }
  0x19   : > { %955 = vmatprep.subr.bf16.mxu1 %v1041_v27 }
  0x1b   : > { %918 = vmatpush3.bf16.msra.mxu0 %v1008_v12 }
  0x1c   : > { %919 = vmatprep.subr.bf16.mxu0 %v1009_v14  ;;  %956 = vmatpush3.bf16.msra.mxu1 %v1019_v35 }
  0x1d   : > { %957 = vmatprep.subr.bf16.mxu1 %v1041_v27 }
  0x1f   : > { %920 = vmatpush3.bf16.msra.mxu0 %v1010_v15 }
  0x20   : > { %921 = vmatprep.subr.bf16.mxu0 %v1011_v16  ;;  %958 = vmatpush3.bf16.msra.mxu1 %v1020_v36 }
  0x21   : > { %959 = vmatprep.subr.bf16.mxu1 %v1041_v27 }
  0x23   : > { %922 = vmatpush3.bf16.msra.mxu0 %v1012_v17 }
  0x24   : > { %967 = vmatprep.subr.bf16.mxu0 %v1041_v27  ;;  %960 = vmatpush3.bf16.msra.mxu1 %v1021_v37 }
  0x25   : > { %961 = vmatprep.subr.bf16.mxu1 %v1041_v27 }
  0x26   : > { %519 = vmatmul.mubr.bf16.vlgmr.msra.gmra.mrb[0].mxu0 %v867_v18 }
  0x27   : > { %983 = vmatprep.mubr.msk.bf16.mxu0 %vm1042_vm0, %v1041_v27  ;;  %968 = vmatpush3.bf16.msra.mxu0 %v1023_v39 }
  0x28   : > { %962 = vmatpush3.bf16.msra.mxu1 %v1022_v38  ;;  %969 = vmatprep.subr.bf16.mxu0 %v1041_v27 }
  0x2b   : > { %970 = vmatpush3.bf16.msra.mxu0 %v1024_v40 }
  0x2c   : > { %971 = vmatprep.subr.bf16.mxu0 %v1041_v27 }
  0x2f   : > { %972 = vmatpush3.bf16.msra.mxu0 %v1025_v41 }
  0x30   : > { %973 = vmatprep.subr.bf16.mxu0 %v1041_v27 }
  0x33   : > { %974 = vmatpush3.bf16.msra.mxu0 %v1026_v42 }
  0x34   : > { %975 = vmatprep.subr.bf16.mxu0 %v1041_v27 }
  0x37   : > { %976 = vmatpush3.bf16.msra.mxu0 %v1027_v43 }
  0x38   : > { %977 = vmatprep.subr.bf16.mxu0 %v1041_v27 }
  0x3b   : > { %978 = vmatpush3.bf16.msra.mxu0 %v1028_v44 }
  0x3c   : > { %979 = vmatprep.subr.bf16.mxu0 %v1041_v27 }
  0x3f   : > { %980 = vmatpush3.bf16.msra.mxu0 %v1029_v45 }
  0x40   : > { %981 = vmatprep.subr.bf16.mxu0 %v1041_v27 }
  0x43   : > { %982 = vmatpush3.bf16.msra.mxu0 %v1030_v56 }
  0xf9   : > { %v923_v19 = vpop.f32.mrb[0].mxu0 }
  0xfa   : > { %v924_v20 = vpop.f32.mrb[1].mxu0 }
  0xfb   : > { %v925_v22 = vadd.f32 %v924_v20, %v923_v19  ;;  %v926_v23 = vpop.f32.mrb[2].mxu0 }
  0xfc   : > { %v927_v24 = vpop.f32.mrb[3].mxu0 }
  0xfd   : > { %v521_v25 = vadd.f32 %v925_v22, %v866_v21 }
  0xff   : > { %526 = vadd.xlane.f32.xlu0 %v521_v25 }
 0x18c   : > { %v527_v29 = vpop.xlane.xlu0 %526 }
 0x18d   : > { %v529_v30 = vmul.f32 0.0078125, %v527_v29 }
 0x18f   : > { %v530_v31 = vsub.f32 %v521_v25, %v529_v30 }
 0x191   : > { %v531_v32 = vmul.f32 %v530_v31, %v530_v31 }
 0x193   : > { %532 = vadd.xlane.f32.xlu0 %v531_v32 }
 0x220   : > { %v533_v46 = vpop.xlane.xlu0 %532 }
 0x221   : > { %v534_v47 = vmul.f32 0.0078125, %v533_v46 }
 0x223   : > { %v535_v48 = vadd.f32 1e-05, %v534_v47 }
 0x225   : > { %1031 = vrsqrt.f32 %v535_v48 }
 0x22f   : > { %v1032_v49 = vpop.eup %1031 }
 0x230   : > { %v537_v51 = vmul.f32 %v1032_v49, %v530_v31 }
 0x232   : > { %v545_v53 = vmul.f32 %v885_v50, %v537_v51 }
 0x234   : > { %v553_v54 = vadd.f32 %v886_v52, %v545_v53 }
 0x236   : > { %v554_v55 = vpack.c.bf16 %v553_v54, %v553_v54 }
 0x238   : > { %964 = vmatmul.mubr.bf16.vlgmr.msra.gmra.mrb[0].mxu1 %v554_v55 }
 0x30b   : > { %v653_v57 = vpop.f32.mrb[0].mxu1 }
 0x30c   : > { %659 = vst [vmem:[%s337_s11] sm:$0xff] %v653_v57  ;;  %v660_v58 = vpack.c.bf16 %v653_v57, %v653_v57  ;;  %v965_v59 = vpop.f32.mrb[1].mxu1 }
 0x30d   : > { %v656_v60 = vpop.f32.mrb[2].mxu1 }
 0x30e   : > { %v966_v61 = vpop.f32.mrb[3].mxu1  ;;  %984 = vmatmul.mubr.bf16.vlgmr.msra.gmra.mrb[4].mxu0 %v660_v58 }
 0x3e1   : > { %v766_v63 = vpop.f32.mrb[4].mxu0 }
 0x3e2   : > { %v767_v0 = vadd.f32 %v895_v62, %v766_v63  ;;  %v985_v1 = vpop.f32.mrb[5].mxu0 }
 0x3e3   : > { %v769_v2 = vpop.f32.mrb[6].mxu0 }
 0x3e4   : > { %772 = vst [vmem:[%s341_s10] sm:$0xff] %v767_v0  ;;  %v986_v3 = vpop.f32.mrb[7].mxu0 }
 0x3e5 PF: > { %s20_s30 = sadd.s32 1, %s1039_s30  }
 0x3e6   : > { %p17_p4 = scmp.ge.s32.totalorder %s20_s30, 4  }
 0x3e8   :  { %19 = sbr.rel (!%p17_p4) target bundleno = 1 (0x1), region = 94 }

// kernel: marine_classifier_forward.1
= control target key start
LH: loop header
LB: loop body
LE: loop exit
PB: predicated region body
PF: predicated region fallthrough
CT: control target
= control target key end

     0   :  { %s1093_s30 = smov 0   ;;  %s1226_s0 = inlined_call_operand.vmem [shape: bf16[16,256], index: 0, kind: input, shape index: {}]   ;;  %s1227_s1 = inlined_call_operand.vmem [shape: bf16[256,128], index: 1, kind: input, shape index: {}]   ;;  %s1228_s2 = inlined_call_operand.vmem [shape: f32[1,128], index: 2, kind: input, shape index: {}]   ;;  %s1229_s3 = inlined_call_operand.vmem [shape: f32[1,128], index: 3, kind: input, shape index: {}]   ;;  %s1230_s4 = inlined_call_operand.vmem [shape: f32[1,128], index: 4, kind: input, shape index: {}]   ;;  %s1231_s5 = inlined_call_operand.vmem [shape: bf16[128,128], index: 5, kind: input, shape index: {}]   ;;  %s1232_s6 = inlined_call_operand.vmem [shape: bf16[128,128], index: 6, kind: input, shape index: {}]   ;;  %s1233_s7 = inlined_call_operand.vmem [shape: f32[1,128], index: 7, kind: input, shape index: {}]   ;;  %s1234_s8 = inlined_call_operand.vmem [shape: f32[16,128], index: 8, kind: output, shape index: {0}]   ;;  %s1235_s9 = inlined_call_operand.vmem [shape: f32[16,128], index: 9, kind: output, shape index: {1}]  }
   0x1 LB: > { %s857_s10 = sadd.s32 4294967295, %s1039_s30   ;;  %p861_p0 = scmp.ge.s32.totalorder %s1039_s30, 1  ;;  %s1039_s30 = sphi %s1093_s30, %s20_s30  }
   0x2   : > { %p290_p1 = scmp.lt.s32.totalorder %s1039_s30, 3 }
   0x4   : > { %p291_p2 = pnand %p861_p0, %p290_p1 }
   0x5   : > { %v997_v0 = vld [vmem:[%s1227_s1 + $0x40] sm:$0xff] (!%p291_p2)   ;;  %v999_v2 = vld [vmem:[%s1227_s1 + $0x48] sm:$0xff] (!%p291_p2)   ;;  %p329_p3 = scmp.lt.s32.totalorder (!%p291_p2), %s857_s10, 1  ;;  %v1001_v4 = vld [vmem:[%s1227_s1 + $0x50] sm:$0xff] (!%p291_p2)   ;;  %v1041_v27 = vmov (!%p291_p2), 0.0   ;;  %vm1042_vm0 = vmmov (!%p291_p2), 0  }
   0x6   : > { %294 = sbr.rel (%p291_p2) target bundleno = 997 (0x3e5), region = 52  ;;  %v998_v1 = vld [vmem:[%s1227_s1] sm:$0xff] (!%p291_p2)   ;;  %907 = vmatprep.subr.bf16.mxu0 (!%p291_p2), %v997_v0  ;;  %v1000_v3 = vld [vmem:[%s1227_s1 + $0x8] sm:$0xff] (!%p291_p2)   ;;  %v1002_v5 = vld [vmem:[%s1227_s1 + $0x10] sm:$0xff] (!%p291_p2)   ;;  %947 = vmatprep.subr.bf16.mxu1 (!%p291_p2), %v1041_v27 }
   0x7   : > { %908 = vmatpush3.bf16.msra.mxu0 (!%p291_p2), %v998_v1  ;;  %v1003_v6 = vld [vmem:[%s1227_s1 + $0x58] sm:$0xff] (!%p291_p2)   ;;  %v1005_v8 = vld [vmem:[%s1227_s1 + $0x60] sm:$0xff] (!%p291_p2)   ;;  %v1007_v10 = vld [vmem:[%s1227_s1 + $0x68] sm:$0xff] (!%p291_p2)   ;;  %963 = vmatprep.mubr.msk.bf16.mxu1 (!%p291_p2), %vm1042_vm0, %v1041_v27 }
   0x8   : > { %909 = vmatprep.subr.bf16.mxu0 (!%p291_p2), %v999_v2  ;;  %v1004_v7 = vld [vmem:[%s1227_s1 + $0x18] sm:$0xff] (!%p291_p2)   ;;  %v1006_v9 = vld [vmem:[%s1227_s1 + $0x20] sm:$0xff] (!%p291_p2)   ;;  %v1008_v12 = vld [vmem:[%s1227_s1 + $0x28] sm:$0xff] (!%p291_p2)  }
   0x9   : > { %v1009_v14 = vld [vmem:[%s1227_s1 + $0x70] sm:$0xff] (!%p291_p2)   ;;  %v1011_v16 = vld [vmem:[%s1227_s1 + $0x78] sm:$0xff] (!%p291_p2)   ;;  %v866_v21 = vld [vmem:[%s1228_s2] ss:$0 sm:$0xff] (!%p291_p2) }
   0xa   : > { %v1010_v15 = vld [vmem:[%s1227_s1 + $0x30] sm:$0xff] (!%p291_p2)   ;;  %v1012_v17 = vld [vmem:[%s1227_s1 + $0x38] sm:$0xff] (!%p291_p2)   ;;  %v1015_v26 = vld [vmem:[%s1231_s5] sm:$0xff] (!%p291_p2)  }
   0xb   : > { %910 = vmatpush3.bf16.msra.mxu0 (!%p291_p2), %v1000_v3  ;;  %948 = vmatpush3.bf16.msra.mxu1 (!%p291_p2), %v1015_v26  ;;  %v1016_v28 = vld [vmem:[%s1231_s5 + $0x8] sm:$0xff] (!%p291_p2)   ;;  %v1017_v33 = vld [vmem:[%s1231_s5 + $0x10] sm:$0xff] (!%p291_p2)   ;;  %v1018_v34 = vld [vmem:[%s1231_s5 + $0x18] sm:$0xff] (!%p291_p2)  }
   0xc   : > { %911 = vmatprep.subr.bf16.mxu0 (!%p291_p2), %v1001_v4  ;;  %949 = vmatprep.subr.bf16.mxu1 (!%p291_p2), %v1041_v27  ;;  %v1019_v35 = vld [vmem:[%s1231_s5 + $0x20] sm:$0xff] (!%p291_p2)   ;;  %v1020_v36 = vld [vmem:[%s1231_s5 + $0x28] sm:$0xff] (!%p291_p2)   ;;  %v1021_v37 = vld [vmem:[%s1231_s5 + $0x30] sm:$0xff] (!%p291_p2)  }
   0xd   : > { %s1237_s10 = smov (!%p329_p3, %s857_s10), 1  ;;  %v1022_v38 = vld [vmem:[%s1231_s5 + $0x38] sm:$0xff]   ;;  %v1023_v39 = vld [vmem:[%s1232_s6] sm:$0xff]   ;;  %v1024_v40 = vld [vmem:[%s1232_s6 + $0x8] sm:$0xff]  }
   0xe   : > { %s1122_s25 = sshll.u32 %s1237_s10, 3  ;;  %v1025_v41 = vld [vmem:[%s1232_s6 + $0x10] sm:$0xff]   ;;  %v1026_v42 = vld [vmem:[%s1232_s6 + $0x18] sm:$0xff]   ;;  %v1027_v43 = vld [vmem:[%s1232_s6 + $0x20] sm:$0xff]  }
   0xf   : > { %912 = vmatpush3.bf16.msra.mxu0 %v1002_v5  ;;  %s333_s13 = scalar_lea.vmem %s1226_s0, %s1122_s25  ;;  %950 = vmatpush3.bf16.msra.mxu1 %v1016_v28  ;;  %v1028_v44 = vld [vmem:[%s1232_s6 + $0x28] sm:$0xff]   ;;  %v1029_v45 = vld [vmem:[%s1232_s6 + $0x30] sm:$0xff]   ;;  %v885_v50 = vld [vmem:[%s1229_s3] ss:$0 sm:$0xff]  ;;  %s337_s11 = scalar_lea.vmem %s1234_s8, %s1122_s25 }
  0x10   : > { %913 = vmatprep.subr.bf16.mxu0 %v1003_v6  ;;  %v343_v11 = vld [vmem:[%s333_s13] sm:$0xff]  ;;  %951 = vmatprep.subr.bf16.mxu1 %v1041_v27  ;;  %v1030_v56 = vld [vmem:[%s1232_s6 + $0x38] sm:$0xff]   ;;  %s341_s10 = scalar_lea.vmem %s1235_s9, %s1122_s25 }
  0x11   : > { %v868_v13 = vcombine.high %v343_v11, %v343_v11  ;;  %v867_v18 = vcombine.low %v343_v11, %v343_v11  ;;  %v886_v52 = vld [vmem:[%s1230_s4] ss:$0 sm:$0xff] }
  0x12   : > { %v895_v62 = vld [vmem:[%s1233_s7] ss:$0 sm:$0xff] }
  0x13   : > { %914 = vmatpush3.bf16.msra.mxu0 %v1004_v7  ;;  %518 = vmatprep.mubr.bf16.mxu0 %v868_v13 }
  0x14   : > { %915 = vmatprep.subr.bf16.mxu0 %v1005_v8  ;;  %952 = vmatpush3.bf16.msra.mxu1 %v1017_v33 }
  0x15   : > { %953 = vmatprep.subr.bf16.mxu1 %v1041_v27 }
  0x17   : > { %916 = vmatpush3.bf16.msra.mxu0 %v1006_v9 }
  0x18   : > { %917 = vmatprep.subr.bf16.mxu0 %v1007_v10  ;;  %954 = vmatpush3.bf16.msra.mxu1 %v1018_v34 }
  0x19   : > { %955 = vmatprep.subr.bf16.mxu1 %v1041_v27 }
  0x1b   : > { %918 = vmatpush3.bf16.msra.mxu0 %v1008_v12 }
  0x1c   : > { %919 = vmatprep.subr.bf16.mxu0 %v1009_v14  ;;  %956 = vmatpush3.bf16.msra.mxu1 %v1019_v35 }
  0x1d   : > { %957 = vmatprep.subr.bf16.mxu1 %v1041_v27 }
  0x1f   : > { %920 = vmatpush3.bf16.msra.mxu0 %v1010_v15 }
  0x20   : > { %921 = vmatprep.subr.bf16.mxu0 %v1011_v16  ;;  %958 = vmatpush3.bf16.msra.mxu1 %v1020_v36 }
  0x21   : > { %959 = vmatprep.subr.bf16.mxu1 %v1041_v27 }
  0x23   : > { %922 = vmatpush3.bf16.msra.mxu0 %v1012_v17 }
  0x24   : > { %967 = vmatprep.subr.bf16.mxu0 %v1041_v27  ;;  %960 = vmatpush3.bf16.msra.mxu1 %v1021_v37 }
  0x25   : > { %961 = vmatprep.subr.bf16.mxu1 %v1041_v27 }
  0x26   : > { %519 = vmatmul.mubr.bf16.vlgmr.msra.gmra.mrb[0].mxu0 %v867_v18 }
  0x27   : > { %983 = vmatprep.mubr.msk.bf16.mxu0 %vm1042_vm0, %v1041_v27  ;;  %968 = vmatpush3.bf16.msra.mxu0 %v1023_v39 }
  0x28   : > { %962 = vmatpush3.bf16.msra.mxu1 %v1022_v38  ;;  %969 = vmatprep.subr.bf16.mxu0 %v1041_v27 }
  0x2b   : > { %970 = vmatpush3.bf16.msra.mxu0 %v1024_v40 }
  0x2c   : > { %971 = vmatprep.subr.bf16.mxu0 %v1041_v27 }
  0x2f   : > { %972 = vmatpush3.bf16.msra.mxu0 %v1025_v41 }
  0x30   : > { %973 = vmatprep.subr.bf16.mxu0 %v1041_v27 }
  0x33   : > { %974 = vmatpush3.bf16.msra.mxu0 %v1026_v42 }
  0x34   : > { %975 = vmatprep.subr.bf16.mxu0 %v1041_v27 }
  0x37   : > { %976 = vmatpush3.bf16.msra.mxu0 %v1027_v43 }
  0x38   : > { %977 = vmatprep.subr.bf16.mxu0 %v1041_v27 }
  0x3b   : > { %978 = vmatpush3.bf16.msra.mxu0 %v1028_v44 }
  0x3c   : > { %979 = vmatprep.subr.bf16.mxu0 %v1041_v27 }
  0x3f   : > { %980 = vmatpush3.bf16.msra.mxu0 %v1029_v45 }
  0x40   : > { %981 = vmatprep.subr.bf16.mxu0 %v1041_v27 }
  0x43   : > { %982 = vmatpush3.bf16.msra.mxu0 %v1030_v56 }
  0xf9   : > { %v923_v19 = vpop.f32.mrb[0].mxu0 }
  0xfa   : > { %v924_v20 = vpop.f32.mrb[1].mxu0 }
  0xfb   : > { %v925_v22 = vadd.f32 %v924_v20, %v923_v19  ;;  %v926_v23 = vpop.f32.mrb[2].mxu0 }
  0xfc   : > { %v927_v24 = vpop.f32.mrb[3].mxu0 }
  0xfd   : > { %v521_v25 = vadd.f32 %v925_v22, %v866_v21 }
  0xff   : > { %526 = vadd.xlane.f32.xlu0 %v521_v25 }
 0x18c   : > { %v527_v29 = vpop.xlane.xlu0 %526 }
 0x18d   : > { %v529_v30 = vmul.f32 0.0078125, %v527_v29 }
 0x18f   : > { %v530_v31 = vsub.f32 %v521_v25, %v529_v30 }
 0x191   : > { %v531_v32 = vmul.f32 %v530_v31, %v530_v31 }
 0x193   : > { %532 = vadd.xlane.f32.xlu0 %v531_v32 }
 0x220   : > { %v533_v46 = vpop.xlane.xlu0 %532 }
 0x221   : > { %v534_v47 = vmul.f32 0.0078125, %v533_v46 }
 0x223   : > { %v535_v48 = vadd.f32 1e-05, %v534_v47 }
 0x225   : > { %1031 = vrsqrt.f32 %v535_v48 }
 0x22f   : > { %v1032_v49 = vpop.eup %1031 }
 0x230   : > { %v537_v51 = vmul.f32 %v1032_v49, %v530_v31 }
 0x232   : > { %v545_v53 = vmul.f32 %v885_v50, %v537_v51 }
 0x234   : > { %v553_v54 = vadd.f32 %v886_v52, %v545_v53 }
 0x236   : > { %v554_v55 = vpack.c.bf16 %v553_v54, %v553_v54 }
 0x238   : > { %964 = vmatmul.mubr.bf16.vlgmr.msra.gmra.mrb[0].mxu1 %v554_v55 }
 0x30b   : > { %v653_v57 = vpop.f32.mrb[0].mxu1 }
 0x30c   : > { %659 = vst [vmem:[%s337_s11] sm:$0xff] %v653_v57  ;;  %v660_v58 = vpack.c.bf16 %v653_v57, %v653_v57  ;;  %v965_v59 = vpop.f32.mrb[1].mxu1 }
 0x30d   : > { %v656_v60 = vpop.f32.mrb[2].mxu1 }
 0x30e   : > { %v966_v61 = vpop.f32.mrb[3].mxu1  ;;  %984 = vmatmul.mubr.bf16.vlgmr.msra.gmra.mrb[4].mxu0 %v660_v58 }
 0x3e1   : > { %v766_v63 = vpop.f32.mrb[4].mxu0 }
 0x3e2   : > { %v767_v0 = vadd.f32 %v895_v62, %v766_v63  ;;  %v985_v1 = vpop.f32.mrb[5].mxu0 }
 0x3e3   : > { %v769_v2 = vpop.f32.mrb[6].mxu0 }
 0x3e4   : > { %772 = vst [vmem:[%s341_s10] sm:$0xff] %v767_v0  ;;  %v986_v3 = vpop.f32.mrb[7].mxu0 }
 0x3e5 PF: > { %s20_s30 = sadd.s32 1, %s1039_s30  }
 0x3e6   : > { %p17_p4 = scmp.ge.s32.totalorder %s20_s30, 4  }
 0x3e8   :  { %19 = sbr.rel (!%p17_p4) target bundleno = 1 (0x1), region = 94 }

</bundles_post_ra>
